<compile_context>
chip_gen: v7x
topology: tpu7x:2x2x1
jax: 0.10.0
libtpu: 0.0.40
codegen_flags: <defaults>
</compile_context>

<pallas_src>
import functools

import jax
import jax.numpy as jnp
from jax.experimental import pallas as pl
from jax.experimental.pallas import tpu as pltpu

LANES = 128              # vreg lane width; last dim of the 2-D slab.
MAX_BLOCK_ROWS = 8192    # 8192 x 128 x 4B = 4 MiB per f32 buffer per pipeline slot.
VMEM_LIMIT_BYTES = 48 * 1024 * 1024   # 3 arrays x 2 slots x 4 MiB = 24 MiB + headroom;
                                      # raises v5e's 16 MiB default, < v7x's 64 MiB physical.
# Below this element count (or for non-128-divisible sizes) a fused XLA
# elementwise op is used instead of pallas_call.  Kept low (one 8x128 f32 tile)
# so small demo/model tensors still exercise the Pallas path; raise toward
# ~256K elements if profiling shows launch overhead dominating tiny tensors.
MIN_PALLAS_ELEMS = 8 * LANES


def _ema_kernel(x_ref, last_ref, out_ref, *, one_minus_alpha):
    # out = last + (1 - alpha) * (x - last); compute in f32, store native dtype.
    x = x_ref[...].astype(jnp.float32)
    last = last_ref[...].astype(jnp.float32)
    out_ref[...] = (last + one_minus_alpha * (x - last)).astype(out_ref.dtype)


def _ema_update_2d(x2d, last2d, alpha, *, block_rows, alias_state):
    """x2d, last2d: (R, LANES) native-dtype slabs. block_rows need not divide R
    (Pallas clips the ragged last block's DMAs)."""
    R, L = x2d.shape
    assert L == LANES
    itemsize = jnp.dtype(x2d.dtype).itemsize
    kernel = functools.partial(_ema_kernel, one_minus_alpha=float(1.0 - alpha))
    return pl.pallas_call(
        kernel,
        out_shape=jax.ShapeDtypeStruct((R, L), x2d.dtype),
        grid_spec=pltpu.PrefetchScalarGridSpec(
            num_scalar_prefetch=0,
            grid=(pl.cdiv(R, block_rows),),
            in_specs=[
                pl.BlockSpec((block_rows, L), lambda i: (i, 0)),
                pl.BlockSpec((block_rows, L), lambda i: (i, 0)),
            ],
            out_specs=pl.BlockSpec((block_rows, L), lambda i: (i, 0)),
        ),
        compiler_params=pltpu.CompilerParams(
            dimension_semantics=("parallel",),
            vmem_limit_bytes=VMEM_LIMIT_BYTES,
        ),
        cost_estimate=pl.CostEstimate(
            flops=2 * R * L,
            transcendentals=0,
            bytes_accessed=3 * R * L * itemsize,
        ),
        # State is overwritten every step: reuse last_average's HBM buffer.
        input_output_aliases=({1: 0} if alias_state else {}),
    )(x2d, last2d)


def _ema_step(x, last, *, alpha, alias_state):
    """(1-alpha)*x + alpha*last elementwise; same shape/dtype as x (jit'd)."""
    shape, dtype = x.shape, x.dtype
    total = x.size
    last = last.astype(dtype)
    one_minus_alpha = float(1.0 - alpha)

    # Fallback: element count not a multiple of 128 lanes, or tiny tensor.
    # A fused XLA elementwise op is already at the 3-pass HBM roofline and
    # avoids any pad/reshape/slice traffic entirely.
    if total % LANES != 0 or total < MIN_PALLAS_ELEMS:
        xf = x.astype(jnp.float32)
        lf = last.astype(jnp.float32)
        return (lf + one_minus_alpha * (xf - lf)).astype(dtype)

    rows = total // LANES
    # block == full array when it fits (legal for any dtype packing); else a
    # fixed 8192-row block (multiple of 8/16/32 -> legal for f32/bf16/int8/fp8)
    # with a ragged, compiler-clipped last block.
    block_rows = rows if rows <= MAX_BLOCK_ROWS else MAX_BLOCK_ROWS
    out2d = _ema_update_2d(
        x.reshape(rows, LANES),        # bitcast, no copy
        last.reshape(rows, LANES),     # bitcast, no copy
        alpha,
        block_rows=block_rows,
        alias_state=alias_state,
    )
    return out2d.reshape(shape)        # bitcast, no copy


class EMA:
    """JAX/Pallas port of the stateful PyTorch EMA module."""

    def __init__(self, alpha, donate_state=True):
        self.alpha = float(alpha)
        self.donate_state = bool(donate_state)
        self.last_average = None
        step = functools.partial(
            _ema_step, alpha=self.alpha, alias_state=self.donate_state)
        self._step = jax.jit(
            step, donate_argnums=(1,) if self.donate_state else ())

    def __call__(self, x):
        x = jnp.asarray(x)
        if self.last_average is None:
            # Copy so that donating the state later never invalidates the
            # caller's own input array.
            self.last_average = jnp.copy(x) if self.donate_state else x
            return self.last_average
        out = self._step(x, self.last_average)
        self.last_average = out
        return out


def _ema_ref(x, last, alpha):
    xf = x.astype(jnp.float32)
    lf = last.astype(jnp.float32)
    return (lf + (1.0 - alpha) * (xf - lf)).astype(x.dtype)


if __name__ == "__main__":
    key = jax.random.PRNGKey(0)
    k1, k2, k3, k4, k5, k6, k7, k8 = jax.random.split(key, 8)
    alpha = 0.9

    # --- f32 NCHW (2,4,16,16) = 2048 elems, 128-divisible -> Pallas path ---
    shape = (2, 4, 16, 16)
    x1 = jax.random.normal(k1, shape, dtype=jnp.float32)
    x2 = jax.random.normal(k2, shape, dtype=jnp.float32)

    ema = EMA(alpha)
    out1 = jax.block_until_ready(ema(x1))          # first call: passthrough
    assert jnp.allclose(out1, x1), "first-call passthrough mismatch"

    out2 = jax.block_until_ready(ema(x2))          # runs the Pallas kernel
    ref2 = _ema_ref(x2, x1, alpha)
    assert jnp.allclose(out2, ref2, atol=1e-6, rtol=1e-6), "EMA step 2 mismatch"
    # NOTE: out2's buffer is donated to the next call; don't read it afterwards.

    out3 = jax.block_until_ready(ema(x1))          # state carries forward
    ref3 = _ema_ref(x1, ref2, alpha)
    assert jnp.allclose(out3, ref3, atol=1e-6, rtol=1e-6), "EMA step 3 mismatch"

    # --- bf16, 128-divisible (2,8,256) -> Pallas path with native bf16 DMA ---
    shape_a = (2, 8, 256)
    y1 = jax.random.normal(k3, shape_a, dtype=jnp.bfloat16)
    y2 = jax.random.normal(k4, shape_a, dtype=jnp.bfloat16)
    ema_b = EMA(alpha)
    b1 = ema_b(y1)
    b2 = jax.block_until_ready(ema_b(y2))
    refb2 = _ema_ref(y2, y1, alpha)
    assert jnp.allclose(b2.astype(jnp.float32), refb2.astype(jnp.float32),
                        atol=2e-2, rtol=2e-2), "bf16 EMA step mismatch"

    # --- bf16, odd size (3,5,7,11) -> fused-XLA fallback (no pad, no slice) ---
    shape_b = (3, 5, 7, 11)
    z1 = jax.random.normal(k5, shape_b, dtype=jnp.bfloat16)
    z2 = jax.random.normal(k6, shape_b, dtype=jnp.bfloat16)
    ema_c = EMA(alpha)
    c1 = ema_c(z1)
    c2 = jax.block_until_ready(ema_c(z2))
    refc2 = _ema_ref(z2, z1, alpha)
    assert jnp.allclose(c2.astype(jnp.float32), refc2.astype(jnp.float32),
                        atol=2e-2, rtol=2e-2), "odd-size bf16 EMA step mismatch"

    # --- direct check of the ragged multi-block grid path (cdiv grid with a
    #     partial last block: R=20 rows, block_rows=8 -> 3 steps, last clipped) ---
    xr = jax.random.normal(k7, (20, LANES), dtype=jnp.float32)
    lr = jax.random.normal(k8, (20, LANES), dtype=jnp.float32)
    outr = jax.block_until_ready(
        _ema_update_2d(xr, lr, alpha, block_rows=8, alias_state=False))
    refr = _ema_ref(xr, lr, alpha)
    assert jnp.allclose(outr, refr, atol=1e-6, rtol=1e-6), \
        "ragged-grid EMA mismatch"

    print("KERNEL_OK")
</pallas_src>

<mosaic_0001>
module attributes {stable_mosaic.version = 11 : i64} {
  func.func @_ema_kernel(%arg0: i32, %arg1: memref<16x128xf32, #tpu.memory_space<vmem>>, %arg2: memref<16x128xf32, #tpu.memory_space<vmem>>, %arg3: memref<16x128xf32, #tpu.memory_space<vmem>>) attributes {dimension_semantics = [#tpu.dimension_semantics<parallel>], iteration_bounds = array<i64: 1>, scalar_prefetch = 0 : i64, scratch_operands = 0 : i64, tpu.core_type = #tpu.core_type<tc>, window_params = [{transform_indices = @transform_0, window_bounds = array<i64: 16, 128>}, {transform_indices = @transform_1, window_bounds = array<i64: 16, 128>}, {transform_indices = @transform_2, window_bounds = array<i64: 16, 128>}]} {
    %c0 = arith.constant 0 : index
    %c0_0 = arith.constant 0 : index
    %0 = vector.load %arg1[%c0, %c0_0] : memref<16x128xf32, #tpu.memory_space<vmem>>, vector<16x128xf32>
    %c0_1 = arith.constant 0 : index
    %c0_2 = arith.constant 0 : index
    %1 = vector.load %arg2[%c0_1, %c0_2] : memref<16x128xf32, #tpu.memory_space<vmem>>, vector<16x128xf32>
    %2 = arith.subf %0, %1 : vector<16x128xf32>
    %cst = arith.constant 1.000000e-01 : f32
    %3 = vector.broadcast %cst : f32 to vector<16x128xf32>
    %4 = arith.mulf %3, %2 : vector<16x128xf32>
    %5 = arith.addf %1, %4 : vector<16x128xf32>
    %c0_3 = arith.constant 0 : index
    %c0_4 = arith.constant 0 : index
    %6 = vector.load %arg3[%c0_3, %c0_4] : memref<16x128xf32, #tpu.memory_space<vmem>>, vector<16x128xf32>
    tpu.vector_store %arg3[%c0_3, %c0_4], %5 {strides = array<i32>} : memref<16x128xf32, #tpu.memory_space<vmem>>, vector<16x128xf32>,
    return
  }
  func.func @transform_0(%arg0: i32) -> (i32, i32) {
    %c0_i32 = arith.constant 0 : i32
    %c0_i32_0 = arith.constant 0 : i32
    return %arg0, %c0_i32 : i32, i32
  }
  func.func @transform_1(%arg0: i32) -> (i32, i32) {
    %c0_i32 = arith.constant 0 : i32
    %c0_i32_0 = arith.constant 0 : i32
    return %arg0, %c0_i32 : i32, i32
  }
  func.func @transform_2(%arg0: i32) -> (i32, i32) {
    %c0_i32 = arith.constant 0 : i32
    %c0_i32_0 = arith.constant 0 : i32
    return %arg0, %c0_i32 : i32, i32
  }
}

</mosaic_0001>

<bundles_post_ra>
// kernel: _ema_step.1
= control target key start
LH: loop header
LB: loop body
LE: loop exit
PB: predicated region body
PF: predicated region fallthrough
CT: control target
= control target key end

     0   :  { %s60_s0 = inlined_call_operand.vmem [shape: f32[16,128], index: 0, kind: input, shape index: {}]   ;;  %s61_s1 = inlined_call_operand.vmem [shape: f32[16,128], index: 1, kind: input, shape index: {}, may-alias: {1,2}]   ;;  %s62_s2 = inlined_call_operand.vmem [shape: f32[16,128], index: 2, kind: output, shape index: {}, may-alias: {1,2}]  }
   0x1   :  { %v11_v0 = vld [vmem:[%s60_s0] sm:$0xff]  ;;  %v12_v2 = vld [vmem:[%s60_s0 + $0x8] sm:$0xff] }
   0x2   :  { %v13_v1 = vld [vmem:[%s61_s1] sm:$0xff]  ;;  %v14_v4 = vld [vmem:[%s61_s1 + $0x8] sm:$0xff] }
   0x3   :  { %v15_v3 = vsub.f32 %v11_v0, %v13_v1  ;;  %v16_v5 = vsub.f32 %v12_v2, %v14_v4 }
   0x5   :  { %v17_v6 = vmul.f32 0.1, %v15_v3  ;;  %v18_v7 = vmul.f32 0.1, %v16_v5 }
   0x7   :  { %v19_v8 = vadd.f32 %v17_v6, %v13_v1  ;;  %v20_v9 = vadd.f32 %v18_v7, %v14_v4 }
   0x9   :  { %21 = vst [vmem:[%s62_s2] sm:$0xff] %v19_v8  ;;  %22 = vst [vmem:[%s62_s2 + $0x8] sm:$0xff] %v20_v9 }

</bundles_post_ra>
